<compile_context>
chip_gen: v7x
topology: tpu7x:2x2x1
jax: 0.10.0
libtpu: 0.0.40
codegen_flags: <defaults>
</compile_context>

<pallas_src>
import jax
import jax.numpy as jnp
from jax import lax
from jax.experimental import pallas as pl
from jax.experimental.pallas import tpu as pltpu

EPS = 1e-5


def _round_up(x, m):
    return ((x + m - 1) // m) * m


def _usable_vmem_bytes():
    """Per-generation VMEM budget (75% of capacity; conservative fallback)."""
    try:
        cap = pltpu.get_tpu_info().vmem_capacity_bytes
    except Exception:
        cap = 64 << 20          # smallest per-core VMEM (v7x)
    return int(cap) * 3 // 4    # ~48 MiB on v7x, ~96 MiB on v5e/v6e


# --------------------- Fused PreNorm + Linear kernel ------------------------
def _prenorm_linear_kernel(x_ref, w_ref, b_ref, o_ref):
    # x_ref: (tile, D)   w_ref: (D, tile_n) bf16 (gamma pre-folded)
    # b_ref: (1, tile_n) f32 (beta pre-folded)   o_ref: (tile, tile_n)
    x = x_ref[...].astype(jnp.float32)
    mean = jnp.mean(x, axis=-1, keepdims=True)
    xc = x - mean
    var = jnp.mean(xc * xc, axis=-1, keepdims=True)   # two-pass variance
    inv = lax.rsqrt(var + EPS)                        # EUP (free slot)
    normed = xc * inv                                 # gamma/beta live in W'/b'
    acc = jnp.dot(normed.astype(jnp.bfloat16), w_ref[...],
                  preferred_element_type=jnp.float32)
    o_ref[...] = (acc + b_ref[...]).astype(o_ref.dtype)


def prepare_prenorm_linear_params(gamma, beta, w, b):
    """One-time parameter prep (do this at model init, NOT per call).

    Folds the LayerNorm affine into the Linear parameters:
        W' = gamma[:, None] * W   (stored bf16 for the MXU)
        b' = beta @ W + b         (f32)
    so the kernel only computes (x - mean) * inv_std @ W' + b'.
    """
    w_f32 = w.astype(jnp.float32)
    w_folded = (gamma.astype(jnp.float32)[:, None] * w_f32).astype(jnp.bfloat16)
    b_folded = beta.astype(jnp.float32) @ w_f32 + b.astype(jnp.float32)
    return w_folded, b_folded


def _choose_tiles(R, D, D_out, x_bytes, o_bytes, tile_rows, usable):
    # >= 2 row steps when possible (v7x megacore), multiple of 8 sublanes.
    tile = max(8, min(_round_up(tile_rows, 8), _round_up(pl.cdiv(R, 2), 8)))
    tile_n = D_out

    def need(t, tn):
        w_bufs = 1 if tn == D_out else 2      # resident weight -> single buffer
        return (2 * t * D * x_bytes           # double-buffered input tiles
                + 2 * t * tn * o_bytes        # double-buffered output tiles
                + w_bufs * (D * tn * 2        # bf16 weight block(s)
                            + 8 * tn * 4)     # bias block(s), sublane padded
                + (2 << 20))                  # compiler scratch headroom

    while need(tile, tile_n) > usable and tile_n > 128:
        tile_n = max(128, _round_up(tile_n // 2, 128))
    while need(tile, tile_n) > usable and tile > 8:
        tile = max(8, _round_up(tile // 2, 8))
    return tile, tile_n


def prenorm_linear_pallas(x, w_folded_bf16, b_folded_f32, *,
                          tile_rows=512, out_dtype=None):
    """Fused fn(LayerNorm(x)) with fn = Linear(D, D_out). x: (B, N, D).

    Takes pre-folded params from prepare_prenorm_linear_params().
    """
    B, N, D = x.shape
    D_in, D_out = w_folded_bf16.shape
    assert D == D_in
    # Keep the output store lane-dense / unmasked; non-aligned dims should use
    # the generic pre_norm() path instead.
    assert D % 128 == 0 and D_out % 128 == 0, \
        "fused path expects D, D_out multiples of 128 (use pre_norm otherwise)"

    out_dtype = x.dtype if out_dtype is None else out_dtype
    R = B * N
    x2d = x.reshape(R, D)
    b2d = b_folded_f32.reshape(1, D_out).astype(jnp.float32)

    usable = _usable_vmem_bytes()
    tile, tile_n = _choose_tiles(
        R, D, D_out,
        jnp.dtype(x.dtype).itemsize, jnp.dtype(out_dtype).itemsize,
        tile_rows, usable)

    grid_r = pl.cdiv(R, tile)        # partial last block clipped by Pallas
    grid_n = pl.cdiv(D_out, tile_n)

    # Resident (constant-index) operands: single-buffer to save VMEM.
    res_kwargs = {"pipeline_mode": pl.Buffered(1)} if grid_n == 1 else {}

    out2d = pl.pallas_call(
        _prenorm_linear_kernel,
        out_shape=jax.ShapeDtypeStruct((R, D_out), out_dtype),
        grid_spec=pltpu.PrefetchScalarGridSpec(
            num_scalar_prefetch=0,
            grid=(grid_r, grid_n),
            in_specs=[
                pl.BlockSpec((tile, D), lambda i, j: (i, 0)),      # x (reused over j)
                pl.BlockSpec((D, tile_n), lambda i, j: (0, j), **res_kwargs),
                pl.BlockSpec((1, tile_n), lambda i, j: (0, j), **res_kwargs),
            ],
            out_specs=pl.BlockSpec((tile, tile_n), lambda i, j: (i, j)),
        ),
        compiler_params=pltpu.CompilerParams(
            dimension_semantics=("parallel", "parallel"),
            vmem_limit_bytes=int(usable),
        ),
    )(x2d, w_folded_bf16, b2d)

    return out2d.reshape(B, N, D_out)


# ------------------ Standalone LayerNorm kernel (generic fn) -----------------
def _layernorm_kernel(x_ref, gamma_ref, beta_ref, o_ref):
    x = x_ref[...].astype(jnp.float32)
    mean = jnp.mean(x, axis=-1, keepdims=True)
    xc = x - mean
    var = jnp.mean(xc * xc, axis=-1, keepdims=True)
    inv = lax.rsqrt(var + EPS)
    y = xc * inv * gamma_ref[...].astype(jnp.float32) + beta_ref[...].astype(jnp.float32)
    o_ref[...] = y.astype(o_ref.dtype)


def layernorm_pallas(x2d, gamma, beta, *, tile_rows=1024):
    R, D = x2d.shape
    usable = _usable_vmem_bytes()
    x_bytes = jnp.dtype(x2d.dtype).itemsize

    tile = max(8, min(_round_up(tile_rows, 8), _round_up(pl.cdiv(R, 2), 8)))
    while (4 * tile * D * x_bytes + 2 * 8 * D * 4 + (2 << 20)) > usable and tile > 8:
        tile = max(8, _round_up(tile // 2, 8))
    grid_r = pl.cdiv(R, tile)        # partial last block clipped by Pallas

    return pl.pallas_call(
        _layernorm_kernel,
        out_shape=jax.ShapeDtypeStruct((R, D), x2d.dtype),
        grid_spec=pltpu.PrefetchScalarGridSpec(
            num_scalar_prefetch=0,
            grid=(grid_r,),
            in_specs=[
                pl.BlockSpec((tile, D), lambda i: (i, 0)),
                pl.BlockSpec((1, D), lambda i: (0, 0), pipeline_mode=pl.Buffered(1)),
                pl.BlockSpec((1, D), lambda i: (0, 0), pipeline_mode=pl.Buffered(1)),
            ],
            out_specs=pl.BlockSpec((tile, D), lambda i: (i, 0)),
        ),
        compiler_params=pltpu.CompilerParams(
            dimension_semantics=("parallel",),
            vmem_limit_bytes=int(usable),
        ),
    )(x2d, gamma.reshape(1, D), beta.reshape(1, D))


def pre_norm(x, gamma, beta, fn, **kwargs):
    """Generic PreNorm: fn(LayerNorm(x), **kwargs), arbitrary fn. x: (B,N,D)."""
    B, N, D = x.shape
    normed = layernorm_pallas(x.reshape(B * N, D), gamma, beta)
    out2d = fn(normed, **kwargs)
    return out2d.reshape(B, N, -1)


# ----------------------------------- Test -----------------------------------
if __name__ == "__main__":
    # Small but lane-dense shapes: D, D_out multiples of 128 keep stores unmasked.
    B, N, D = 2, 64, 128
    D_out = 128
    key = jax.random.PRNGKey(0)
    kx, kg, kbt, kw, kb, kx2 = jax.random.split(key, 6)

    x = jax.random.normal(kx, (B, N, D), dtype=jnp.float32)
    gamma = 1.0 + 0.1 * jax.random.normal(kg, (D,), dtype=jnp.float32)
    beta = 0.05 * jax.random.normal(kbt, (D,), dtype=jnp.float32)
    w = jax.random.normal(kw, (D, D_out), dtype=jnp.float32) * 0.02
    b = jax.random.normal(kb, (D_out,), dtype=jnp.float32) * 0.02

    # One-time parameter prep (fold LN affine into the Linear, cast bf16).
    w_f, b_f = prepare_prenorm_linear_params(gamma, beta, w, b)

    def ref_layernorm(xx):
        mean = jnp.mean(xx, axis=-1, keepdims=True)
        var = jnp.mean(jnp.square(xx - mean), axis=-1, keepdims=True)
        return (xx - mean) * lax.rsqrt(var + EPS) * gamma + beta

    # 1) Fused PreNorm + Linear path (row count divides tile).
    out = jax.block_until_ready(prenorm_linear_pallas(x, w_f, b_f))
    normed_ref = ref_layernorm(x)
    ref = (normed_ref.reshape(B * N, D) @ w + b).reshape(B, N, D_out)
    # bf16 matmul operands -> loosen tolerance vs. the pure-f32 reference.
    assert jnp.allclose(out, ref, atol=1e-2, rtol=1e-2), "fused PreNorm mismatch"

    # 2) Ragged token count (exercises the partial final block — no pad/slice).
    Nr = 50
    xr = jax.random.normal(kx2, (B, Nr, D), dtype=jnp.float32)
    out_r = jax.block_until_ready(prenorm_linear_pallas(xr, w_f, b_f))
    ref_r = (ref_layernorm(xr).reshape(B * Nr, D) @ w + b).reshape(B, Nr, D_out)
    assert jnp.allclose(out_r, ref_r, atol=1e-2, rtol=1e-2), "ragged PreNorm mismatch"

    # 3) Standalone LN kernel used by the generic path (f32 end-to-end).
    ln = jax.block_until_ready(
        layernorm_pallas(x.reshape(B * N, D), gamma, beta)).reshape(B, N, D)
    assert jnp.allclose(ln, normed_ref, atol=1e-4, rtol=1e-4), "LN kernel mismatch"

    # TODO(synk): fn in PreNorm is arbitrary; only fn = Linear is fused here,
    # other fn's go through pre_norm() (LN kernel + user fn).
    print("KERNEL_OK")
</pallas_src>

<mosaic_0001>
module attributes {stable_mosaic.version = 11 : i64} {
  func.func @_prenorm_linear_kernel(%arg0: i32, %arg1: i32, %arg2: memref<64x128xf32, #tpu.memory_space<vmem>>, %arg3: memref<128x128xbf16, #tpu.memory_space<vmem>>, %arg4: memref<1x128xf32, #tpu.memory_space<vmem>>, %arg5: memref<64x128xf32, #tpu.memory_space<vmem>>) attributes {dimension_semantics = [#tpu.dimension_semantics<parallel>, #tpu.dimension_semantics<parallel>], iteration_bounds = array<i64: 2, 1>, scalar_prefetch = 0 : i64, scratch_operands = 0 : i64, tpu.core_type = #tpu.core_type<tc>, window_params = [{transform_indices = @transform_0, window_bounds = array<i64: 64, 128>}, {pipeline_mode = #tpu.pipeline_mode<synchronous>, transform_indices = @transform_1, window_bounds = array<i64: 128, 128>}, {pipeline_mode = #tpu.pipeline_mode<synchronous>, transform_indices = @transform_2, window_bounds = array<i64: 1, 128>}, {transform_indices = @transform_3, window_bounds = array<i64: 64, 128>}]} {
    %c0 = arith.constant 0 : index
    %c0_0 = arith.constant 0 : index
    %0 = vector.load %arg2[%c0, %c0_0] : memref<64x128xf32, #tpu.memory_space<vmem>>, vector<64x128xf32>
    %cst = arith.constant dense<0.000000e+00> : vector<64xf32>
    %1 = vector.multi_reduction <add>, %0, %cst [1] : vector<64x128xf32> to vector<64xf32>
    %2 = vector.shape_cast %1 : vector<64xf32> to vector<64x1xf32>
    %cst_1 = arith.constant 1.280000e+02 : f32
    %3 = vector.broadcast %cst_1 : f32 to vector<64x1xf32>
    %4 = arith.divf %2, %3 : vector<64x1xf32>
    %5 = vector.broadcast %4 : vector<64x1xf32> to vector<64x128xf32>
    %6 = arith.subf %0, %5 : vector<64x128xf32>
    %7 = arith.mulf %6, %6 : vector<64x128xf32>
    %cst_2 = arith.constant dense<0.000000e+00> : vector<64xf32>
    %8 = vector.multi_reduction <add>, %7, %cst_2 [1] : vector<64x128xf32> to vector<64xf32>
    %9 = vector.shape_cast %8 : vector<64xf32> to vector<64x1xf32>
    %cst_3 = arith.constant 1.280000e+02 : f32
    %10 = vector.broadcast %cst_3 : f32 to vector<64x1xf32>
    %11 = arith.divf %9, %10 : vector<64x1xf32>
    %cst_4 = arith.constant 9.99999974E-6 : f32
    %12 = vector.broadcast %cst_4 : f32 to vector<64x1xf32>
    %13 = arith.addf %11, %12 : vector<64x1xf32>
    %14 = math.rsqrt %13 : vector<64x1xf32>
    %15 = vector.broadcast %14 : vector<64x1xf32> to vector<64x128xf32>
    %16 = arith.mulf %6, %15 : vector<64x128xf32>
    %17 = arith.truncf %16 : vector<64x128xf32> to vector<64x128xbf16>
    %c0_5 = arith.constant 0 : index
    %c0_6 = arith.constant 0 : index
    %18 = vector.load %arg3[%c0_5, %c0_6] : memref<128x128xbf16, #tpu.memory_space<vmem>>, vector<128x128xbf16>
    %cst_7 = arith.constant dense<0.000000e+00> : vector<64x128xf32>
    %19 = tpu.matmul %17, %18, %cst_7 {dimension_numbers = #tpu.dot_dimension_numbers<[1], [0], [0], [1], [0, 0, 1, 1], [], []>} : vector<64x128xbf16>, vector<128x128xbf16>, vector<64x128xf32> -> vector<64x128xf32>
    %c0_8 = arith.constant 0 : index
    %c0_9 = arith.constant 0 : index
    %20 = vector.load %arg4[%c0_8, %c0_9] : memref<1x128xf32, #tpu.memory_space<vmem>>, vector<1x128xf32>
    %21 = vector.broadcast %20 : vector<1x128xf32> to vector<64x128xf32>
    %22 = arith.addf %19, %21 : vector<64x128xf32>
    %c0_10 = arith.constant 0 : index
    %c0_11 = arith.constant 0 : index
    %23 = vector.load %arg5[%c0_10, %c0_11] : memref<64x128xf32, #tpu.memory_space<vmem>>, vector<64x128xf32>
    tpu.vector_store %arg5[%c0_10, %c0_11], %22 {strides = array<i32>} : memref<64x128xf32, #tpu.memory_space<vmem>>, vector<64x128xf32>,
    return
  }
  func.func @transform_0(%arg0: i32, %arg1: i32) -> (i32, i32) {
    %c0_i32 = arith.constant 0 : i32
    %c0_i32_0 = arith.constant 0 : i32
    return %arg0, %c0_i32 : i32, i32
  }
  func.func @transform_1(%arg0: i32, %arg1: i32) -> (i32, i32) {
    %c0_i32 = arith.constant 0 : i32
    %c0_i32_0 = arith.constant 0 : i32
    return %c0_i32, %arg1 : i32, i32
  }
  func.func @transform_2(%arg0: i32, %arg1: i32) -> (i32, i32) {
    %c0_i32 = arith.constant 0 : i32
    %c0_i32_0 = arith.constant 0 : i32
    return %c0_i32, %arg1 : i32, i32
  }
  func.func @transform_3(%arg0: i32, %arg1: i32) -> (i32, i32) {
    %c0_i32 = arith.constant 0 : i32
    return %arg0, %arg1 : i32, i32
  }
}

</mosaic_0001>

<bundles_post_ra>
// kernel: tpu_custom_call.1
= control target key start
LH: loop header
LB: loop body
LE: loop exit
PB: predicated region body
PF: predicated region fallthrough
CT: control target
= control target key end

     0   :  { %8 = vsyncpa [#allocation3], 0  ;;  %s1234_s0 = inlined_call_operand.hbm [shape: f32[128,128], index: 0, kind: input, shape index: {}]   ;;  %s1235_s1 = inlined_call_operand.hbm [shape: bf16[128,128], index: 1, kind: input, shape index: {}]   ;;  %s1236_s2 = inlined_call_operand.vmem [shape: f32[1,128], index: 2, kind: input, shape index: {}]   ;;  %s1237_s3 = inlined_call_operand.hbm [shape: f32[128,128], index: 3, kind: output, shape index: {}]  }
   0x1   :  { %10 = vsyncpa [#allocation3 + $0x1], 0 }
   0x2   :  { %11 = vsyncpa [#allocation6], 0 }
   0x3   :  { %12 = vsyncpa [#allocation4], 0 }
   0x4   :  { %14 = vsyncpa [#allocation4 + $0x1], 0  ;;  %s968_s12 = smov 0   ;;  %s970_s13 = smov 0  }
   0x5   :  { %s972_s14 = smov 0   ;;  %s974_s15 = smov 0  }
   0x6   :  { %s976_s16 = smov 0   ;;  %s978_s17 = smov 0  }
   0x7 LB: > { %s609_s18 = sadd.s32 4294967295, %s937_s17   ;;  %s610_s19 = sadd.s32 4294967294, %s937_s17   ;;  %s937_s17 = sphi %s978_s17, %s20_s17   ;;  %s933_s16 = sphi %s976_s16, %s1261_s16   ;;  %s929_s15 = sphi %s974_s15, %s1260_s15   ;;  %s925_s14 = sphi %s972_s14, %s1259_s14   ;;  %s921_s13 = sphi %s970_s13, %s1258_s13   ;;  %s917_s12 = sphi %s968_s12, %s1257_s12  }
   0x8   : > { %p52_p0 = scmp.ne.s32.totalorder %s921_s13, %s917_s12  ;;  %p1002_p1 = scmp.eq.s32.totalorder %s609_s18, 0 }
   0x9   : > { %p1006_p2 = scmp.eq.s32.totalorder %s609_s18, 1  ;;  %p136_p3 = scmp.eq.s32.totalorder %s610_s19, 1 }
   0xa   : > { %s1242_s20 = scalar_select %p1002_p1, 1, 0 }
   0xb   : > { %s1243_s21 = scalar_select %p1006_p2, 1, 0 }
   0xc   : > { %p1012_p4 = por %p1002_p1, %p52_p0  ;;  %p611_p5 = scmp.ge.s32.totalorder %s937_s17, 1 }
   0xd   : > { %p1017_p6 = por %p136_p3, %p52_p0  ;;  %p143_p7 = scmp.lt.s32.totalorder %s937_s17, 3 }
   0xe   : > { %s1244_s22 = scalar_select %p1012_p4, 1, 0 }
   0xf   : > { %s1245_s23 = scalar_select %p1017_p6, 1, 0 }
  0x10   : > { %p1022_p8 = pnand %p611_p5, %p143_p7  ;;  %s939_s25 = smov [#allocation5]  }
  0x11   : > { %s157_s26 = sshll.u32 %s939_s25, 4  ;;  %s32_s28 = sadd.s32 1, %s933_s16  ;;  %s158_s26 = int_to_ptr.vmem [resolvable:$true] %s157_s26 }
  0x12   : > { %s1246_s24 = scalar_select %p1022_p8, 1, 0 }
  0x13   : > { %p698_p9 = pneg %p1022_p8  ;;  %s793_s4 = scalar_lea.hbm %s1235_s1, 1024 }
  0x14   : > { %p794_p12 = scmp.ne.s32.totalorder %s1235_s1, %s793_s4  ;;  %p800_p5 = scmp.lt.u32.totalorder %s793_s4, %s1235_s1 }
  0x15   : > { %p1031_p11 = pnand %p698_p9, %p1002_p1 }
  0x17   : > { %p795_p13 = pneg %p1031_p11 }
  0x19   : > { %p796_p0 = pnand %p795_p13, %p794_p12 }
  0x1b   : > { %p797_p3 = pneg %p796_p0 }
  0x1d   : > { %p802_p7 = pnand %p800_p5, %p797_p3 }
  0x1f   : > { %805 = shalt.err (!%p802_p7)
}
  0x20   : > { %s806_s9 = scalar_lea.vmem %s158_s26, 1024  ;;  %p814_p1 = scmp.lt.s32.totalorder %s158_s26, %s158_s26 }
  0x21   : > { %p807_p9 = scmp.ne.s32.totalorder %s158_s26, %s806_s9  ;;  %p815_p4 = scmp.lt.s32.totalorder %s806_s9, %s806_s9 }
  0x23   : > { %p809_p10 = pnand %p807_p9, %p795_p13  ;;  %p816_p8 = por %p815_p4, %p814_p1 }
  0x25   : > { %p810_p6 = pneg %p809_p10 }
  0x27   : > { %p817_p2 = pnand %p816_p8, %p810_p6 }
  0x29   : > { %820 = shalt.err (!%p817_p2)
}
  0x2a   : > { %s940_s10 = smov 64   ;;  %s941_s11 = smov 4  }
  0x2b   : > { %701 = dma.hbm_to_vmem [thread:$0]  (!%p1031_p11), %s1235_s1, 1024, %s158_s26, [#allocation6], %s940_s10, %s940_s10, %s941_s11  }
  0x2c   : > { %p34_p1 = scmp.ge.s32.totalorder %s32_s28, 2  ;;  %s39_s25 = sadd.s32 1, %s925_s14 }
  0x2d   : > { %p46_p2 = scmp.ne.s32.totalorder %s925_s14, %s921_s13  ;;  %p47_p4 = scmp.eq.s32.totalorder %s937_s17, 0 }
  0x2e   : > { %s1263_s28 = smov (%p34_p1, %s32_s28), 0  ;;  %p1249_p8 = scmp.ne.s32.totalorder %s1243_s21, 0 }
  0x2f   : > { %p1058_p6 = por %p47_p4, %p46_p2  ;;  %s36_s27 = ssub.s32 %s933_s16, %s1263_s28 }
  0x30   : > { %p1064_p10 = por %p1249_p8, %p46_p2  ;;  %p711_p12 = scmp.lt.s32.totalorder %s937_s17, 2 }
  0x31   : > { %p37_p11 = scmp.eq.s32.totalorder %s36_s27, 0  ;;  %s177_s26 = sand.u32 1, %s925_s14  }
  0x32   : > { %s615_s4 = sshll.u32 %s177_s26, 6  ;;  %s636_s6 = sshll.u32 %s933_s16, 10 }
  0x33   : > { %s1073_s5 = scalar_select %p37_p11, %s925_s14, %s39_s25  }
  0x34   : > { %s1079_s9 = scalar_lea.hbm %s1234_s0, %s636_s6  ;;  %s181_s21 = scalar_lea.vmem [#allocation2], %s615_s4 }
  0x35   : > { %s188_s10 = sshll.u32 %s181_s21, 4  ;;  %p1085_p13 = pnand %p711_p12, %p1058_p6  ;;  %s1081_s10 = int_to_ptr.vmem [resolvable:$true] %s188_s10 }
  0x36   : > { %s1089_s18 = scalar_lea.sflag [#allocation3], %s177_s26  ;;  %s821_s19 = scalar_lea.hbm %s1079_s9, 1024 }
  0x37   : > { %p822_p0 = scmp.ne.s32.totalorder %s1079_s9, %s821_s19  ;;  %p823_p3 = pneg %p1085_p13 }
  0x38   : > { %s826_s29 = scalar_lea.hbm %s1234_s0, 2048  ;;  %p827_p9 = scmp.lt.u32.totalorder %s1079_s9, %s1234_s0 }
  0x39   : > { %p824_p5 = pnand %p823_p3, %p822_p0  ;;  %p828_p1 = scmp.lt.u32.totalorder %s826_s29, %s821_s19 }
  0x3a   : > { %p830_p4 = scmp.lt.u32.totalorder %s821_s19, %s1079_s9 }
  0x3b   : > { %p825_p7 = pneg %p824_p5  ;;  %p829_p2 = por %p828_p1, %p827_p9 }
  0x3d   : > { %p831_p6 = por %p830_p4, %p829_p2 }
  0x3f   : > { %p832_p8 = pnand %p831_p6, %p825_p7 }
  0x41   : > { %835 = shalt.err (!%p832_p8)
}
  0x42   : > { %s836_s26 = scalar_lea.vmem %s1081_s10, 1024  ;;  %s942_s7 = smov [#allocation2]  }
  0x43   : > { %p837_p12 = scmp.ne.s32.totalorder %s1081_s10, %s836_s26  ;;  %s841_s8 = sshll.u32 %s942_s7, 4  ;;  %s842_s8 = int_to_ptr.vmem [resolvable:$false] %s841_s8 }
  0x44   : > { %s843_s21 = scalar_lea.vmem %s842_s8, 2048  ;;  %p844_p5 = scmp.lt.s32.totalorder %s1081_s10, %s842_s8 }
  0x45   : > { %p839_p11 = pnand %p837_p12, %p823_p3  ;;  %p845_p9 = scmp.lt.s32.totalorder %s843_s21, %s836_s26 }
  0x47   : > { %p840_p0 = pneg %p839_p11  ;;  %p846_p1 = por %p845_p9, %p844_p5 }
  0x49   : > { %p847_p2 = pnand %p846_p1, %p840_p0 }
  0x4b   : > { %850 = shalt.err (!%p847_p2)
}
  0x4c   : > { %s943_s19 = smov 128   ;;  %s944_s25 = smov 8  }
  0x4d   : > { %705 = dma.hbm_to_vmem [thread:$0]  (!%p1085_p13), %s1079_s9, 1024, %s1081_s10, %s1089_s18, %s943_s19, %s943_s19, %s944_s25  }
  0x4e   : > { %p1252_p3 = scmp.ne.s32.totalorder %s1246_s24, 0 }
  0x4f   : > { %s1120_s27 = sand.u32 (!%p1252_p3), 1, %s921_s13   ;;  %p1253_p7 = scmp.ne.s32.totalorder (!%p1252_p3), %s1244_s22, 0 }
  0x50   : > { %200 = sbr.rel (%p1252_p3) target bundleno = 649 (0x289), region = 32  ;;  %s619_s29 = sshll.u32 (!%p1252_p3), %s1120_s27, 6 }
  0x51   : > { %s203_s4 = scalar_lea.sflag (!%p1252_p3), [#allocation3], %s1120_s27  ;;  %s206_s6 = scalar_lea.vmem (!%p1252_p3), [#allocation2], %s619_s29 }
  0x57   : > { %904 = dma.done.wait (%p1253_p7), %s203_s4, 1024  }
  0x58   : > { %906 = vsyncadd (%p1253_p7), %s203_s4, 4294966272  ;;  %p1254_p13 = scmp.ne.s32.totalorder %s1242_s20, 0 }
  0x5a   : > { %908 = dma.done.wait (%p1254_p13), [#allocation6], 1024  }
  0x5b   : > { %910 = vsyncadd (%p1254_p13), [#allocation6], 4294966272  ;;  %v242_v0 = vld [vmem:[%s206_s6] sm:$0xff]  ;;  %v243_v2 = vld [vmem:[%s206_s6 + $0x8] sm:$0xff]  ;;  %s235_s24 = scalar_lea.vmem [#allocation7], %s619_s29  ;;  %s637_s10 = sshll.u32 %s929_s15, 10 }
  0x5c   : > { %v246_v1 = vld [vmem:[%s206_s6 + $0x20] sm:$0xff]  ;;  %250 = vadd.xlane.f32.xlu0 %v242_v0  ;;  %v247_v3 = vld [vmem:[%s206_s6 + $0x28] sm:$0xff]  ;;  %v244_v4 = vld [vmem:[%s206_s6 + $0x10] sm:$0xff]  ;;  %s502_s9 = sshll.u32 %s235_s24, 4  ;;  %s1185_s15 = scalar_lea.hbm %s1237_s3, %s637_s10  ;;  %s1180_s9 = int_to_ptr.vmem [resolvable:$true] %s502_s9 }
  0x5d   : > { %258 = vadd.xlane.f32.xlu1 %v246_v1  ;;  %v245_v5 = vld [vmem:[%s206_s6 + $0x18] sm:$0xff]  ;;  %v248_v6 = vld [vmem:[%s206_s6 + $0x30] sm:$0xff]  ;;  %v769_v8 = vld [vmem:[#allocation5] sm:$0xff]   ;;  %s488_s26 = scalar_lea.sflag [#allocation4], %s1120_s27  ;;  %s851_s7 = scalar_lea.vmem %s1180_s9, 1024 }
  0x5e   : > { %v249_v7 = vld [vmem:[%s206_s6 + $0x38] sm:$0xff]  ;;  %650 = vmatprep.subr.bf16.mxu0 %v769_v8  ;;  %674 = vmatprep.subr.bf16.mxu1 %v769_v8  ;;  %v770_v41 = vld [vmem:[#allocation5 + $0x8] sm:$0xff]   ;;  %v771_v42 = vld [vmem:[#allocation5 + $0x10] sm:$0xff]   ;;  %p852_p4 = scmp.ne.s32.totalorder %s1180_s9, %s851_s7  ;;  %s945_s8 = smov [#allocation7]  }
  0x5f   : > { %651 = vmatpush3.bf16.msra.mxu0 %v769_v8  ;;  %682 = vmatpush3.bf16.msra.mxu1 %v769_v8  ;;  %v772_v43 = vld [vmem:[#allocation5 + $0x18] sm:$0xff]   ;;  %v773_v44 = vld [vmem:[#allocation5 + $0x20] sm:$0xff]   ;;  %v774_v45 = vld [vmem:[#allocation5 + $0x28] sm:$0xff]   ;;  %s855_s21 = sshll.u32 %s945_s8, 4  ;;  %s856_s21 = int_to_ptr.vmem [resolvable:$false] %s855_s21 }
  0x60   : > { %252 = vadd.xlane.f32.xlu0 %v243_v2  ;;  %652 = vmatprep.subr.bf16.mxu0 %v770_v41  ;;  %v775_v46 = vld [vmem:[#allocation5 + $0x30] sm:$0xff]   ;;  %v776_v47 = vld [vmem:[#allocation5 + $0x38] sm:$0xff]   ;;  %p853_p6 = pnand %p852_p4, %p1064_p10  ;;  %s857_s19 = scalar_lea.vmem %s856_s21, 2048 }
  0x61   : > { %260 = vadd.xlane.f32.xlu1 %v247_v3  ;;  %675 = vmatprep.subr.bf16.mxu1 %v770_v41  ;;  %p858_p12 = scmp.lt.s32.totalorder %s1180_s9, %s856_s21  ;;  %p859_p11 = scmp.lt.s32.totalorder %s857_s19, %s851_s7 }
  0x62   : > { %p854_p8 = pneg %p853_p6 }
  0x63   : > { %653 = vmatpush3.bf16.msra.mxu0 %v770_v41  ;;  %683 = vmatpush3.bf16.msra.mxu1 %v770_v41  ;;  %p860_p0 = por %p859_p11, %p858_p12 }
  0x64   : > { %254 = vadd.xlane.f32.xlu0 %v244_v4  ;;  %654 = vmatprep.subr.bf16.mxu0 %v771_v42 }
  0x65   : > { %256 = vadd.xlane.f32.xlu1 %v245_v5  ;;  %676 = vmatprep.subr.bf16.mxu1 %v771_v42  ;;  %p861_p5 = pnand %p860_p0, %p854_p8 }
  0x67   : > { %655 = vmatpush3.bf16.msra.mxu0 %v771_v42  ;;  %684 = vmatpush3.bf16.msra.mxu1 %v771_v42 }
  0x68   : > { %262 = vadd.xlane.f32.xlu0 %v248_v6  ;;  %656 = vmatprep.subr.bf16.mxu0 %v772_v43 }
  0x69   : > { %264 = vadd.xlane.f32.xlu1 %v249_v7  ;;  %677 = vmatprep.subr.bf16.mxu1 %v772_v43 }
  0x6b   : > { %657 = vmatpush3.bf16.msra.mxu0 %v772_v43  ;;  %685 = vmatpush3.bf16.msra.mxu1 %v772_v43 }
  0x6c   : > { %658 = vmatprep.subr.bf16.mxu0 %v773_v44  ;;  %678 = vmatprep.subr.bf16.mxu1 %v773_v44 }
  0x6f   : > { %659 = vmatpush3.bf16.msra.mxu0 %v773_v44  ;;  %686 = vmatpush3.bf16.msra.mxu1 %v773_v44 }
  0x70   : > { %660 = vmatprep.subr.bf16.mxu0 %v774_v45  ;;  %679 = vmatprep.subr.bf16.mxu1 %v774_v45 }
  0x73   : > { %661 = vmatpush3.bf16.msra.mxu0 %v774_v45  ;;  %687 = vmatpush3.bf16.msra.mxu1 %v774_v45 }
  0x74   : > { %662 = vmatprep.subr.bf16.mxu0 %v775_v46  ;;  %680 = vmatprep.subr.bf16.mxu1 %v775_v46 }
  0x77   : > { %663 = vmatpush3.bf16.msra.mxu0 %v775_v46  ;;  %688 = vmatpush3.bf16.msra.mxu1 %v775_v46 }
  0x78   : > { %664 = vmatprep.subr.bf16.mxu0 %v776_v47  ;;  %681 = vmatprep.subr.bf16.mxu1 %v776_v47 }
  0x7b   : > { %665 = vmatpush3.bf16.msra.mxu0 %v776_v47  ;;  %689 = vmatpush3.bf16.msra.mxu1 %v776_v47 }
  0xe9   : > { %v251_v9 = vpop.xlane.xlu0 %250 }
  0xea   : > { %v259_v10 = vpop.xlane.xlu1 %258  ;;  %v267_v11 = vmul.f32 0.0078125, %v251_v9 }
  0xeb   : > { %v271_v12 = vmul.f32 0.0078125, %v259_v10 }
  0xec   : > { %v1134_v13 = vsub.f32 %v242_v0, %v267_v11 }
  0xed   : > { %v1136_v14 = vsub.f32 %v246_v1, %v271_v12  ;;  %v253_v15 = vpop.xlane.xlu0 %252 }
  0xee   : > { %v261_v16 = vpop.xlane.xlu1 %260  ;;  %v268_v17 = vmul.f32 0.0078125, %v253_v15  ;;  %v283_v18 = vmul.f32 %v1134_v13, %v1134_v13 }
  0xef   : > { %v272_v19 = vmul.f32 0.0078125, %v261_v16  ;;  %v287_v22 = vmul.f32 %v1136_v14, %v1136_v14 }
  0xf0   : > { %v1140_v20 = vsub.f32 %v243_v2, %v268_v17  ;;  %291 = vadd.xlane.f32.xlu0 %v283_v18 }
  0xf1   : > { %v1142_v21 = vsub.f32 %v247_v3, %v272_v19  ;;  %v255_v23 = vpop.xlane.xlu0 %254 }
  0xf2   : > { %v257_v24 = vpop.xlane.xlu1 %256  ;;  %v269_v25 = vmul.f32 0.0078125, %v255_v23  ;;  %v284_v26 = vmul.f32 %v1140_v20, %v1140_v20 }
  0xf3   : > { %v270_v27 = vmul.f32 0.0078125, %v257_v24  ;;  %v288_v30 = vmul.f32 %v1142_v21, %v1142_v21 }
  0xf4   : > { %v1148_v28 = vsub.f32 %v244_v4, %v269_v25  ;;  %299 = vadd.xlane.f32.xlu0 %v287_v22  ;;  %293 = vadd.xlane.f32.xlu1 %v284_v26 }
  0xf5   : > { %v1150_v29 = vsub.f32 %v245_v5, %v270_v27  ;;  %v263_v31 = vpop.xlane.xlu0 %262 }
  0xf6   : > { %v265_v32 = vpop.xlane.xlu1 %264  ;;  %v273_v33 = vmul.f32 0.0078125, %v263_v31  ;;  %v285_v34 = vmul.f32 %v1148_v28, %v1148_v28 }
  0xf7   : > { %v274_v35 = vmul.f32 0.0078125, %v265_v32  ;;  %v286_v38 = vmul.f32 %v1150_v29, %v1150_v29 }
  0xf8   : > { %v1156_v36 = vsub.f32 %v248_v6, %v273_v33  ;;  %301 = vadd.xlane.f32.xlu1 %v288_v30  ;;  %295 = vadd.xlane.f32.xlu0 %v285_v34 }
  0xf9   : > { %v1158_v37 = vsub.f32 %v249_v7, %v274_v35 }
  0xfa   : > { %v289_v39 = vmul.f32 %v1156_v36, %v1156_v36 }
  0xfb   : > { %v290_v40 = vmul.f32 %v1158_v37, %v1158_v37 }
  0xfc   : > { %297 = vadd.xlane.f32.xlu1 %v286_v38  ;;  %303 = vadd.xlane.f32.xlu0 %v289_v39 }
 0x100   : > { %305 = vadd.xlane.f32.xlu1 %v290_v40 }
 0x17d   : > { %v292_v48 = vpop.xlane.xlu0 %291 }
 0x17e   : > { %v307_v49 = vmul.f32 0.0078125, %v292_v48 }
 0x180   : > { %v315_v50 = vadd.f32 1e-05, %v307_v49 }
 0x181   : > { %v294_v51 = vpop.xlane.xlu1 %293  ;;  %v300_v52 = vpop.xlane.xlu0 %299 }
 0x182   : > { %v308_v53 = vmul.f32 0.0078125, %v294_v51  ;;  %v311_v54 = vmul.f32 0.0078125, %v300_v52  ;;  %777 = vrsqrt.f32 %v315_v50 }
 0x184   : > { %v316_v55 = vadd.f32 1e-05, %v308_v53  ;;  %v319_v56 = vadd.f32 1e-05, %v311_v54 }
 0x185   : > { %v302_v57 = vpop.xlane.xlu1 %301  ;;  %v296_v58 = vpop.xlane.xlu0 %295 }
 0x186   : > { %779 = vrsqrt.f32 %v316_v55  ;;  %v312_v59 = vmul.f32 0.0078125, %v302_v57  ;;  %v309_v60 = vmul.f32 0.0078125, %v296_v58 }
 0x187   : > { %781 = vrsqrt.f32 %v319_v56 }
 0x188   : > { %v320_v61 = vadd.f32 1e-05, %v312_v59  ;;  %v317_v62 = vadd.f32 1e-05, %v309_v60 }
 0x189   : > { %v298_v63 = vpop.xlane.xlu1 %297  ;;  %v304_v0 = vpop.xlane.xlu0 %303 }
 0x18a   : > { %783 = vrsqrt.f32 %v320_v61  ;;  %v310_v1 = vmul.f32 0.0078125, %v298_v63  ;;  %v313_v2 = vmul.f32 0.0078125, %v304_v0 }
 0x18b   : > { %785 = vrsqrt.f32 %v317_v62 }
 0x18c   : > { %v318_v3 = vadd.f32 1e-05, %v310_v1  ;;  %v321_v4 = vadd.f32 1e-05, %v313_v2  ;;  %v778_v6 = vpop.eup %777 }
 0x18d   : > { %v306_v5 = vpop.xlane.xlu1 %305  ;;  %v331_v10 = vmul.f32 %v778_v6, %v1134_v13 }
 0x18e   : > { %787 = vrsqrt.f32 %v318_v3  ;;  %v314_v7 = vmul.f32 0.0078125, %v306_v5 }
 0x18f   : > { %789 = vrsqrt.f32 %v321_v4 }
 0x190   : > { %v780_v8 = vpop.eup %779  ;;  %v322_v9 = vadd.f32 1e-05, %v314_v7 }
 0x191   : > { %v332_v11 = vmul.f32 %v780_v8, %v1140_v20  ;;  %v782_v12 = vpop.eup %781 }
 0x192   : > { %791 = vrsqrt.f32 %v322_v9  ;;  %v335_v17 = vmul.f32 %v782_v12, %v1136_v14 }
 0x193   : > { %v339_v15 = vpack.c.bf16 %v332_v11, %v331_v10 }
 0x194   : > { %v784_v16 = vpop.eup %783 }
 0x195   : > { %666 = vmatprep.mubr.bf16.mxu0 %v339_v15  ;;  %v336_v18 = vmul.f32 %v784_v16, %v1142_v21  ;;  %v786_v19 = vpop.eup %785  ;;  %v622_v21 = vld [vmem:[%s1236_s2] ss:$0 sm:$0xff] }
 0x196   : > { %v333_v24 = vmul.f32 %v786_v19, %v1148_v28 }
 0x197   : > { %v341_v22 = vpack.c.bf16 %v336_v18, %v335_v17 }
 0x198   : > { %v788_v23 = vpop.eup %787 }
 0x199   : > { %670 = vmatprep.mubr.bf16.mxu1 %v341_v22  ;;  %v334_v13 = vmul.f32 %v788_v23, %v1150_v29  ;;  %v790_v25 = vpop.eup %789 }
 0x19a   : > { %v337_v27 = vmul.f32 %v790_v25, %v1156_v36 }
 0x19b   : > { %v340_v20 = vpack.c.bf16 %v334_v13, %v333_v24 }
 0x19c   : > { %v792_v26 = vpop.eup %791 }
 0x19d   : > { %667 = vmatmul.mubr.bf16.vlgmr.msra.gmra.mrb[0].mxu0 %v340_v20  ;;  %v338_v30 = vmul.f32 %v792_v26, %v1158_v37 }
 0x19f   : > { %v342_v14 = vpack.c.bf16 %v338_v30, %v337_v27 }
 0x1a1   : > { %671 = vmatmul.mubr.bf16.vlgmr.msra.gmra.mrb[0].mxu1 %v342_v14 }
 0x270   : > { %v668_v31 = vpop.f32.mrb[0].mxu0 }
 0x271   : > { %v457_v28 = vadd.f32 %v668_v31, %v622_v21  ;;  %v448_v32 = vpop.f32.mrb[1].mxu0 }
 0x272   : > { %v449_v33 = vadd.f32 %v622_v21, %v448_v32  ;;  %v669_v29 = vpop.f32.mrb[2].mxu0 }
 0x273   : > { %481 = vst [vmem:[%s235_s24 + $0x10] sm:$0xff] %v457_v28  ;;  %v460_v34 = vadd.f32 %v669_v29, %v622_v21  ;;  %v451_v35 = vpop.f32.mrb[3].mxu0 }
 0x274   : > { %479 = vst [vmem:[%s235_s24] sm:$0xff] %v449_v33  ;;  %v452_v36 = vadd.f32 %v622_v21, %v451_v35  ;;  %v672_v37 = vpop.f32.mrb[0].mxu1 }
 0x275   : > { %482 = vst [vmem:[%s235_s24 + $0x18] sm:$0xff] %v460_v34  ;;  %v473_v38 = vadd.f32 %v672_v37, %v622_v21  ;;  %v464_v39 = vpop.f32.mrb[1].mxu1 }
 0x276   : > { %480 = vst [vmem:[%s235_s24 + $0x8] sm:$0xff] %v452_v36  ;;  %v465_v40 = vadd.f32 %v622_v21, %v464_v39  ;;  %v673_v41 = vpop.f32.mrb[2].mxu1 }
 0x277   : > { %485 = vst [vmem:[%s235_s24 + $0x30] sm:$0xff] %v473_v38  ;;  %v476_v42 = vadd.f32 %v673_v41, %v622_v21  ;;  %v467_v43 = vpop.f32.mrb[3].mxu1 }
 0x278   : > { %483 = vst [vmem:[%s235_s24 + $0x20] sm:$0xff] %v465_v40  ;;  %v468_v44 = vadd.f32 %v622_v21, %v467_v43 }
 0x279   : > { %486 = vst [vmem:[%s235_s24 + $0x38] sm:$0xff] %v476_v42 }
 0x27a   : > { %484 = vst [vmem:[%s235_s24 + $0x28] sm:$0xff] %v468_v44 }
 0x27b   : > { %864 = shalt.err (!%p861_p5)
}
 0x27c   : > { %s865_s25 = scalar_lea.hbm %s1185_s15, 1024  ;;  %s869_s6 = scalar_lea.hbm %s1237_s3, 2048 }
 0x27d   : > { %p866_p9 = scmp.ne.s32.totalorder %s1185_s15, %s865_s25  ;;  %p870_p3 = scmp.lt.u32.totalorder %s1185_s15, %s1237_s3 }
 0x27e   : > { %p871_p7 = scmp.lt.u32.totalorder %s869_s6, %s865_s25  ;;  %p873_p4 = scmp.lt.u32.totalorder %s865_s25, %s1185_s15 }
 0x27f   : > { %p867_p1 = pnand %p866_p9, %p1064_p10 }
 0x280   : > { %p872_p13 = por %p871_p7, %p870_p3 }
 0x281   : > { %p868_p2 = pneg %p867_p1 }
 0x282   : > { %p874_p6 = por %p873_p4, %p872_p13 }
 0x284   : > { %p875_p8 = pnand %p874_p6, %p868_p2 }
 0x286   : > { %878 = shalt.err (!%p875_p8)
}
 0x287   : > { %s946_s24 = smov 128   ;;  %s947_s10 = smov 8  }
 0x288   : > { %696 = dma.vmem_to_hbm [thread:$0]  (%p1064_p10), %s1180_s9, 1024, %s1185_s15, %s488_s26, %s946_s24, %s946_s24, %s947_s10  }
 0x289 PF: > { %s517_s11 = sand.u32 1, %s917_s12   ;;  %p1255_p12 = scmp.ne.s32.totalorder %s1245_s23, 0 }
 0x28a   : > { %p1256_p11 = scmp.ge.s32.totalorder %s937_s17, 2  ;;  %s518_s18 = scalar_lea.sflag [#allocation4], %s517_s11 }
 0x28c   : > { %p707_p0 = pnand %p1256_p11, %p1255_p12 }
 0x28e   : > { %912 = dma.done.wait (!%p707_p0), %s518_s18, 1024  }
 0x28f   : > { %914 = vsyncadd (!%p707_p0), %s518_s18, 4294966272  ;;  %s20_s17 = sadd.s32 1, %s937_s17   ;;  %s1257_s12 = smov %s921_s13 }
 0x290   : > { %p17_p5 = scmp.ge.s32.totalorder %s20_s17, 4   ;;  %s1258_s13 = smov %s925_s14 }
 0x291   : > { %s1259_s14 = smov %s1073_s5  ;;  %s1260_s15 = smov %s933_s16 }
 0x292   : > { %s1261_s16 = smov %s1263_s28  ;;  %19 = sbr.rel (!%p17_p5) target bundleno = 7 (0x7), region = 85 }
 0x299   :  { %523 = vsyncpa [#allocation3], 1 }
 0x29a   :  { %525 = vsyncpa [#allocation3 + $0x1], 1 }
 0x29b   :  { %526 = vsyncpa [#allocation6], 1 }
 0x29c   :  { %527 = vsyncpa [#allocation4], 1 }
 0x29d   :  { %529 = vsyncpa [#allocation4 + $0x1], 1 }

</bundles_post_ra>
